<compile_context>
chip_gen: v7x
topology: tpu7x:2x2x1
jax: 0.10.0
libtpu: 0.0.40
codegen_flags: <defaults>
</compile_context>

<pallas_src>
import functools

import jax
import jax.numpy as jnp
from jax.experimental import pallas as pl
from jax.experimental.pallas import tpu as pltpu

_LANES = 128
_SUBLANES = 8


def _round_up(n, m):
    return ((n + m - 1) // m) * m


def _round_down(n, m):
    return (n // m) * m


def _cdiv(a, b):
    return (a + b - 1) // b


def _vmem_limit_bytes():
    # Generation-aware cap: ~96 MiB on 128-MiB VMEM parts (v5e/v6e), ~48 MiB on
    # v7x (64 MiB physical).  Conservative fallback if the query is unavailable.
    try:
        cap = int(pltpu.get_tpu_info().vmem_capacity_bytes)
    except Exception:
        cap = 64 << 20
    return max(16 << 20, (cap * 3) // 4)


def _pick_tile_rows(rows, bytes_per_row_pair, vmem_limit, max_rows):
    """Rows per grid step: biggest double-buffered tile that fits the VMEM budget."""
    if rows <= _SUBLANES:
        return rows                                   # single full-extent block
    budget = max(vmem_limit - (4 << 20), 4 << 20)     # headroom for residents
    cap = budget // (2 * bytes_per_row_pair)          # x2: double buffering
    tb = min(max_rows, cap, rows)
    # Keep >= 4 grid steps on large inputs: megacore sharding (v7x) + pipelining.
    if rows >= 4 * 512:
        tb = min(tb, _cdiv(rows, 4))
    tb = max(_SUBLANES, _round_down(tb, _SUBLANES))
    tb = min(tb, _round_down(rows, _SUBLANES))
    return tb


def _gfp_packed_kernel(x_ref, wsel_ref, phase_ref, out_ref, *, groups):
    # x_ref:     (TB, groups)  f32 -- `groups` consecutive time steps per packed row
    # wsel_ref:  (groups, 128) f32 -- row g: 2*pi*W tiled across lanes, zeroed
    #                                 outside lane-group g (resident, tiny)
    # phase_ref: (1, 128)      f32 -- +pi/2 on the cos half of every lane-group
    # out_ref:   (TB, 128)     f32 -- lane-dense packed [sin|cos] rows
    #
    # Assemble the packed projection with full-width VPU broadcasts: for each
    # group, lane-broadcast its x column and multiply by the group-masked
    # weights, then sum.  One jnp.sin over fully packed vregs covers sin AND
    # cos (cos(t) == sin(t + pi/2)), and the store is an unmasked full-width vst.
    proj = x_ref[:, 0:1] * wsel_ref[0:1, :]
    for g in range(1, groups):
        proj = proj + x_ref[:, g : g + 1] * wsel_ref[g : g + 1, :]
    out_ref[...] = jnp.sin(proj + phase_ref[...])


def _gfp_general_kernel(x_ref, w_ref, out_ref, *, half, split_store):
    # x_ref: (TB, 1), w_ref: (1, half), out_ref: (TB, 2*half)
    proj = x_ref[...] * w_ref[...]        # rank-1 outer product on the VPU (no MXU)
    s = jnp.sin(proj)
    c = jnp.cos(proj)
    if split_store:
        # half % 128 == 0: both slice stores are lane-aligned and unmasked;
        # skipping the concat avoids an extra (TB, 2*half) vreg pack.
        out_ref[:, :half] = s
        out_ref[:, half:] = c
    else:
        # half % 128 != 0: a single full-block store avoids two masked
        # half-width slice stores when 2*half is lane-aligned.
        out_ref[...] = jnp.concatenate([s, c], axis=-1)


def make_gaussian_fourier_projection(W, *, max_rows_per_tile=16384):
    """Build the forward fn for a fixed W (mirrors the nn.Module holding W)."""
    half = int(W.shape[0])
    out_dim = 2 * half
    # One-time constant fold of 2*pi into the fixed (requires_grad=False) weights.
    w2pi = (jnp.asarray(W, jnp.float32) * (2.0 * jnp.pi)).reshape(half)
    w_row = w2pi.reshape(1, half)                      # general-path resident W

    vmem_limit = _vmem_limit_bytes()

    # Lane-packed fast-path constants (only when 128 % out_dim == 0).
    packable = out_dim > 0 and _LANES % out_dim == 0 and (_LANES // out_dim) <= 16
    if packable:
        groups = _LANES // out_dim
        lane = jnp.arange(_LANES)
        wrow = jnp.tile(jnp.concatenate([w2pi, w2pi]), groups)           # (128,)
        wsel = jnp.where(
            (lane // out_dim)[None, :] == jnp.arange(groups)[:, None],
            wrow[None, :], 0.0).astype(jnp.float32)                      # (groups, 128)
        phase = jnp.tile(
            jnp.concatenate([jnp.zeros((half,), jnp.float32),
                             jnp.full((half,), jnp.pi / 2.0, jnp.float32)]),
            groups).reshape(1, _LANES)                                   # (1, 128)

    def _forward_packed(x):
        B = x.shape[0]
        rows = B // groups
        x2 = x.astype(jnp.float32).reshape(rows, groups)   # free reshape, contiguous HBM
        # VMEM rows: x (groups lanes, pads to 128) + out (128 lanes), both f32.
        row_pair_bytes = 4 * (_LANES + _LANES)
        tb = _pick_tile_rows(rows, row_pair_bytes, vmem_limit, max_rows_per_tile)
        n_tiles = _cdiv(rows, tb)
        vmem_req = int(min(vmem_limit, 2 * tb * row_pair_bytes + (8 << 20)))
        cost = pl.CostEstimate(
            flops=3 * B * out_dim,
            transcendentals=B * out_dim,
            bytes_accessed=4 * (B + B * out_dim + (groups + 1) * _LANES),
        )
        out = pl.pallas_call(
            functools.partial(_gfp_packed_kernel, groups=groups),
            out_shape=jax.ShapeDtypeStruct((rows, _LANES), jnp.float32),
            grid=(n_tiles,),
            in_specs=[
                pl.BlockSpec((tb, groups), lambda i: (i, 0)),
                pl.BlockSpec((groups, _LANES), lambda i: (0, 0)),   # resident
                pl.BlockSpec((1, _LANES), lambda i: (0, 0)),        # resident
            ],
            out_specs=pl.BlockSpec((tb, _LANES), lambda i: (i, 0)),
            compiler_params=pltpu.CompilerParams(
                dimension_semantics=("parallel",),
                vmem_limit_bytes=vmem_req,
            ),
            cost_estimate=cost,
        )(x2, wsel, phase)
        # Packed rows are a pure reshape of (B, out_dim): same HBM bytes, no copy.
        return out.reshape(B, out_dim)

    def _forward_general(x):
        B = x.shape[0]
        x2 = x.astype(jnp.float32).reshape(B, 1)
        out_row_bytes = 4 * _round_up(out_dim, _LANES)
        row_pair_bytes = 4 * _LANES + out_row_bytes
        tb = _pick_tile_rows(B, row_pair_bytes, vmem_limit, max_rows_per_tile)
        n_tiles = _cdiv(B, tb)
        split_store = (half % _LANES == 0)
        vmem_req = int(min(vmem_limit, 2 * tb * row_pair_bytes + (8 << 20)))
        cost = pl.CostEstimate(
            flops=2 * B * out_dim,
            transcendentals=B * out_dim,
            bytes_accessed=4 * (B + B * out_dim + half),
        )
        # TODO(synk): x is loaded as a (tb, 1) sublane-major block (lane-padded in
        # VMEM); a lane-dense (1, tb) load + in-kernel relayout would shrink its
        # footprint, but needs a lanes->sublanes reshape lowering.  This fallback
        # path keeps the proven-safe layout (x is minor vs. the output for the
        # embed_dims that reach it); the hot small-embed_dim shapes use the
        # packed path above.
        return pl.pallas_call(
            functools.partial(_gfp_general_kernel, half=half, split_store=split_store),
            out_shape=jax.ShapeDtypeStruct((B, out_dim), jnp.float32),
            grid=(n_tiles,),
            in_specs=[
                pl.BlockSpec((tb, 1), lambda i: (i, 0)),
                pl.BlockSpec((1, half), lambda i: (0, 0)),          # resident
            ],
            out_specs=pl.BlockSpec((tb, out_dim), lambda i: (i, 0)),
            compiler_params=pltpu.CompilerParams(
                dimension_semantics=("parallel",),
                vmem_limit_bytes=vmem_req,
            ),
            cost_estimate=cost,
        )(x2, w_row)

    def forward(x):
        B = int(x.shape[0])
        if packable and B % (_LANES // out_dim) == 0:
            return _forward_packed(x)
        return _forward_general(x)

    return jax.jit(forward)


if __name__ == "__main__":
    key = jax.random.PRNGKey(0)
    k_w, k_x = jax.random.split(key)

    def reference(x, W):
        proj = x[:, None] * W[None, :] * 2.0 * jnp.pi
        return jnp.concatenate([jnp.sin(proj), jnp.cos(proj)], axis=-1)

    # Primary: module-consistent small shape (hits the lane-packed fast path).
    embed_dim, scale, batch = 32, 30.0, 8
    W = jax.random.normal(k_w, (embed_dim // 2,), dtype=jnp.float32) * scale
    x = jax.random.uniform(k_x, (batch,), dtype=jnp.float32)
    out = jax.block_until_ready(make_gaussian_fourier_projection(W)(x))
    assert out.shape == (batch, embed_dim)
    # 2*pi fold + sin(t + pi/2) for cos differ from the reference op order by a
    # few f32 ulps of the argument (|arg| up to a few hundred -> ~1e-4 in sin/cos).
    assert jnp.allclose(out, reference(x, W), atol=1e-3, rtol=1e-3)

    # Secondary: general path, split-store branch, ragged last grid block.
    k_w2, k_x2 = jax.random.split(k_x)
    W2 = jax.random.normal(k_w2, (128,), dtype=jnp.float32) * scale   # embed_dim = 256
    x2 = jax.random.uniform(k_x2, (10,), dtype=jnp.float32)
    out2 = jax.block_until_ready(make_gaussian_fourier_projection(W2)(x2))
    assert out2.shape == (10, 256)
    assert jnp.allclose(out2, reference(x2, W2), atol=1e-3, rtol=1e-3)

    # Tertiary: general path, concat-store branch (B not a multiple of the pack factor).
    x3 = jax.random.uniform(k_x2, (6,), dtype=jnp.float32)
    out3 = jax.block_until_ready(make_gaussian_fourier_projection(W)(x3))
    assert out3.shape == (6, embed_dim)
    assert jnp.allclose(out3, reference(x3, W), atol=1e-3, rtol=1e-3)

    print("KERNEL_OK")
</pallas_src>

<mosaic_0001>
module attributes {stable_mosaic.version = 11 : i64} {
  func.func @_gfp_packed_kernel(%arg0: i32, %arg1: memref<2x4xf32, #tpu.memory_space<vmem>>, %arg2: memref<4x128xf32, #tpu.memory_space<vmem>>, %arg3: memref<1x128xf32, #tpu.memory_space<vmem>>, %arg4: memref<2x128xf32, #tpu.memory_space<vmem>>) attributes {dimension_semantics = [#tpu.dimension_semantics<parallel>], iteration_bounds = array<i64: 1>, scalar_prefetch = 0 : i64, scratch_operands = 0 : i64, tpu.core_type = #tpu.core_type<tc>, window_params = [{transform_indices = @transform_0, window_bounds = array<i64: 2, 4>}, {pipeline_mode = #tpu.pipeline_mode<synchronous>, transform_indices = @transform_1, window_bounds = array<i64: 4, 128>}, {pipeline_mode = #tpu.pipeline_mode<synchronous>, transform_indices = @transform_2, window_bounds = array<i64: 1, 128>}, {transform_indices = @transform_3, window_bounds = array<i64: 2, 128>}]} {
    %c0 = arith.constant 0 : index
    %c0_0 = arith.constant 0 : index
    %0 = vector.load %arg1[%c0, %c0_0] : memref<2x4xf32, #tpu.memory_space<vmem>>, vector<2x1xf32>
    %c0_1 = arith.constant 0 : index
    %c0_2 = arith.constant 0 : index
    %1 = vector.load %arg2[%c0_1, %c0_2] : memref<4x128xf32, #tpu.memory_space<vmem>>, vector<1x128xf32>
    %2 = vector.broadcast %0 : vector<2x1xf32> to vector<2x128xf32>
    %3 = vector.broadcast %1 : vector<1x128xf32> to vector<2x128xf32>
    %4 = arith.mulf %2, %3 : vector<2x128xf32>
    %c0_3 = arith.constant 0 : index
    %c1 = arith.constant 1 : index
    %5 = vector.load %arg1[%c0_3, %c1] : memref<2x4xf32, #tpu.memory_space<vmem>>, vector<2x1xf32>
    %c1_4 = arith.constant 1 : index
    %c0_5 = arith.constant 0 : index
    %6 = vector.load %arg2[%c1_4, %c0_5] : memref<4x128xf32, #tpu.memory_space<vmem>>, vector<1x128xf32>
    %7 = vector.broadcast %5 : vector<2x1xf32> to vector<2x128xf32>
    %8 = vector.broadcast %6 : vector<1x128xf32> to vector<2x128xf32>
    %9 = arith.mulf %7, %8 : vector<2x128xf32>
    %10 = arith.addf %4, %9 : vector<2x128xf32>
    %c0_6 = arith.constant 0 : index
    %c2 = arith.constant 2 : index
    %11 = vector.load %arg1[%c0_6, %c2] : memref<2x4xf32, #tpu.memory_space<vmem>>, vector<2x1xf32>
    %c2_7 = arith.constant 2 : index
    %c0_8 = arith.constant 0 : index
    %12 = vector.load %arg2[%c2_7, %c0_8] : memref<4x128xf32, #tpu.memory_space<vmem>>, vector<1x128xf32>
    %13 = vector.broadcast %11 : vector<2x1xf32> to vector<2x128xf32>
    %14 = vector.broadcast %12 : vector<1x128xf32> to vector<2x128xf32>
    %15 = arith.mulf %13, %14 : vector<2x128xf32>
    %16 = arith.addf %10, %15 : vector<2x128xf32>
    %c0_9 = arith.constant 0 : index
    %c3 = arith.constant 3 : index
    %17 = vector.load %arg1[%c0_9, %c3] : memref<2x4xf32, #tpu.memory_space<vmem>>, vector<2x1xf32>
    %c3_10 = arith.constant 3 : index
    %c0_11 = arith.constant 0 : index
    %18 = vector.load %arg2[%c3_10, %c0_11] : memref<4x128xf32, #tpu.memory_space<vmem>>, vector<1x128xf32>
    %19 = vector.broadcast %17 : vector<2x1xf32> to vector<2x128xf32>
    %20 = vector.broadcast %18 : vector<1x128xf32> to vector<2x128xf32>
    %21 = arith.mulf %19, %20 : vector<2x128xf32>
    %22 = arith.addf %16, %21 : vector<2x128xf32>
    %c0_12 = arith.constant 0 : index
    %c0_13 = arith.constant 0 : index
    %23 = vector.load %arg3[%c0_12, %c0_13] : memref<1x128xf32, #tpu.memory_space<vmem>>, vector<1x128xf32>
    %24 = vector.broadcast %23 : vector<1x128xf32> to vector<2x128xf32>
    %25 = arith.addf %22, %24 : vector<2x128xf32>
    %26 = math.sin %25 : vector<2x128xf32>
    %c0_14 = arith.constant 0 : index
    %c0_15 = arith.constant 0 : index
    %27 = vector.load %arg4[%c0_14, %c0_15] : memref<2x128xf32, #tpu.memory_space<vmem>>, vector<2x128xf32>
    tpu.vector_store %arg4[%c0_14, %c0_15], %26 {strides = array<i32>} : memref<2x128xf32, #tpu.memory_space<vmem>>, vector<2x128xf32>,
    return
  }
  func.func @transform_0(%arg0: i32) -> (i32, i32) {
    %c0_i32 = arith.constant 0 : i32
    %c0_i32_0 = arith.constant 0 : i32
    return %arg0, %c0_i32 : i32, i32
  }
  func.func @transform_1(%arg0: i32) -> (i32, i32) {
    %c0_i32 = arith.constant 0 : i32
    %c0_i32_0 = arith.constant 0 : i32
    %c0_i32_1 = arith.constant 0 : i32
    return %c0_i32, %c0_i32_0 : i32, i32
  }
  func.func @transform_2(%arg0: i32) -> (i32, i32) {
    %c0_i32 = arith.constant 0 : i32
    %c0_i32_0 = arith.constant 0 : i32
    %c0_i32_1 = arith.constant 0 : i32
    return %c0_i32, %c0_i32_0 : i32, i32
  }
  func.func @transform_3(%arg0: i32) -> (i32, i32) {
    %c0_i32 = arith.constant 0 : i32
    %c0_i32_0 = arith.constant 0 : i32
    return %arg0, %c0_i32 : i32, i32
  }
}

</mosaic_0001>

<bundles_post_ra>
// kernel: forward.1
= control target key start
LH: loop header
LB: loop body
LE: loop exit
PB: predicated region body
PF: predicated region fallthrough
CT: control target
= control target key end

     0   :  { %v208_v0 = vmov 0   ;;  %v209_v2 = vmov 2   ;;  %v210_v3 = vmov 1   ;;  %v211_v4 = vmov 3   ;;  %s280_s0 = inlined_call_operand.vmem [shape: f32[2,4], index: 0, kind: input, shape index: {}]   ;;  %s281_s1 = inlined_call_operand.vmem [shape: f32[4,128], index: 1, kind: input, shape index: {}]   ;;  %s282_s2 = inlined_call_operand.vmem [shape: f32[1,128], index: 2, kind: input, shape index: {}]   ;;  %s283_s3 = inlined_call_operand.vmem [shape: f32[2,128], index: 3, kind: output, shape index: {}]  }
   0x1   :  { %199 = vset.pattern.permute.xlu0 %v208_v0  ;;  %v14_v1 = vld [vmem:[%s280_s0] sm:$0x3]  ;;  %201 = vset.pattern.permute.xlu1 %v209_v2  ;;  %v178_v9 = vld [vmem:[%s281_s1 + $0x2] ss:$0 sm:$0xff]  ;;  %v179_v11 = vld [vmem:[%s281_s1 + $0x3] ss:$0 sm:$0xff] }
   0x2   :  { %18 = vperm.xlu0 %199, %v14_v1   ;;  %39 = vperm.xlu1 %201, %v14_v1   ;;  %v176_v7 = vld [vmem:[%s281_s1] ss:$0 sm:$0xff]  ;;  %v177_v8 = vld [vmem:[%s281_s1 + $0x1] ss:$0 sm:$0xff]  ;;  %v212_v32 = vmov 683565275  }
   0x3   :  { %v180_v19 = vld [vmem:[%s282_s2] ss:$0 sm:$0xff]  ;;  %v213_v34 = vmov 2475754826   ;;  %v214_v37 = vmov 2131351028  }
   0x4   :  { %v215_v40 = vmov 2102212464   ;;  %v216_v43 = vmov 920167782   ;;  %v217_v46 = vmov 1326507024  }
   0x6   :  { %200 = vset.pattern.permute.xlu0 %v210_v3  ;;  %202 = vset.pattern.permute.xlu1 %v211_v4 }
   0x7   :  { %28 = vperm.xlu0 %200, %v14_v1   ;;  %50 = vperm.xlu1 %202, %v14_v1  }
   0xb   :  { %203 = vset.pattern.permute.xlu0 %v211_v4 }
  0x81   :  { %v19_v5 = vpop.permute.xlu0 %18  ;;  %v40_v6 = vpop.permute.xlu1 %39 }
  0x82   :  { %v25_v13 = vmul.f32 %v176_v7, %v19_v5  ;;  %v46_v15 = vmul.f32 %v178_v9, %v40_v6 }
  0x86   :  { %v29_v10 = vpop.permute.xlu0 %28  ;;  %v51_v12 = vpop.permute.xlu1 %50 }
  0x87   :  { %v35_v14 = vmul.f32 %v177_v8, %v29_v10  ;;  %v57_v17 = vmul.f32 %v179_v11, %v51_v12 }
  0x89   :  { %v36_v16 = vadd.f32 %v35_v14, %v25_v13 }
  0x8b   :  { %v47_v18 = vadd.f32 %v46_v15, %v36_v16 }
  0x8d   :  { %v58_v20 = vadd.f32 %v57_v17, %v47_v18 }
  0x8f   :  { %v256_v21 = vadd.f32 %v180_v19, %v58_v20 }
  0x91   :  { %v70_v22 = vand.u32 2139095040, %v256_v21  ;;  %v67_v26 = vand.u32 2147483647, %v256_v21  ;;  %vm69_vm7 = vcmp.lt.s32.totalorder %v256_v21, 0  ;;  %vm159_vm12 = vweird.f32 %v256_v21 }
  0x93   :  { %v71_v23 = vshrl.u32 %v70_v22, 23  ;;  %v74_v29 = vand.u32 8388607, %v67_v26  ;;  %vm68_vm8 = vcmp.le.f32.partialorder %v67_v26, 0.7853982 }
  0x95   :  { %v181_v24 = vadd.s32 4294967169, %v71_v23  ;;  %v75_v48 = vor.u32 8388608, %v74_v29 }
  0x97   :  { %v77_v25 = vadd.s32 1, %v181_v24  ;;  %v115_v62 = vshll.u32 %v75_v48, 8 }
  0x99   :  { %vm78_vm0 = vcmp.gt.s32.totalorder %v77_v25, 0 }
  0x9a   :  { %v79_v27 = vsel %vm78_vm0, %v77_v25, 0 }
  0x9b   :  { %v81_v28 = vand.u32 31, %v79_v27  ;;  %v80_v31 = vshrl.u32 %v79_v27, 5 }
  0x9d   :  { %v82_v30 = vsub.s32 32, %v81_v28  ;;  %v84_v33 = vshll.u32 %v212_v32, %v81_v28  ;;  %v87_v35 = vshll.u32 %v213_v34, %v81_v28  ;;  %v90_v39 = vshll.u32 %v214_v37, %v81_v28 }
  0x9e   :  { %v93_v42 = vshll.u32 %v215_v40, %v81_v28  ;;  %v96_v45 = vshll.u32 %v216_v43, %v81_v28  ;;  %vm99_vm1 = vcmp.lt.s32.totalorder %v80_v31, 1  ;;  %vm102_vm2 = vcmp.lt.s32.totalorder %v80_v31, 4 }
  0x9f   :  { %v85_v36 = vshrl.u32 %v213_v34, %v82_v30  ;;  %v88_v38 = vshrl.u32 %v214_v37, %v82_v30  ;;  %v91_v41 = vshrl.u32 %v215_v40, %v82_v30  ;;  %v94_v44 = vshrl.u32 %v216_v43, %v82_v30 }
  0xa0   :  { %v97_v47 = vshrl.u32 %v217_v46, %v82_v30  ;;  %v83_v57 = vshrl.u32 %v212_v32, %v82_v30  ;;  %vm101_vm3 = vcmp.lt.s32.totalorder %v80_v31, 3  ;;  %vm100_vm4 = vcmp.lt.s32.totalorder %v80_v31, 2 }
  0xa1   :  { %v86_v49 = vor.u32 %v85_v36, %v84_v33  ;;  %v89_v50 = vor.u32 %v88_v38, %v87_v35  ;;  %v92_v51 = vor.u32 %v91_v41, %v90_v39  ;;  %v95_v52 = vor.u32 %v94_v44, %v93_v42 }
  0xa2   :  { %v98_v53 = vor.u32 %v97_v47, %v96_v45 }
  0xa3   :  { %v104_v54 = vsel %vm102_vm2, %v92_v51, 2102212464  ;;  %v107_v55 = vsel %vm99_vm1, %v86_v49, %v89_v50  ;;  %v111_v56 = vsel %vm99_vm1, %v89_v50, %v92_v51  ;;  %v108_v58 = vsel %vm102_vm2, %v95_v52, 920167782 }
  0xa4   :  { %v112_v59 = vsel %vm102_vm2, %v98_v53, 1326507024  ;;  %v109_v60 = vsel %vm101_vm3, %v92_v51, %v108_v58  ;;  %v103_v63 = vsel %vm99_vm1, %v83_v57, %v86_v49  ;;  %v105_v0 = vsel %vm101_vm3, %v89_v50, %v104_v54 }
  0xa5   :  { %v113_v61 = vsel %vm101_vm3, %v95_v52, %v112_v59  ;;  %v110_v1 = vsel %vm100_vm4, %v107_v55, %v109_v60  ;;  %v106_v7 = vsel %vm100_vm4, %v103_v63, %v105_v0 }
  0xa6   :  { %v114_v2 = vsel %vm100_vm4, %v111_v56, %v113_v61  ;;  %v265_v5 = vmul.u32.u64.low %v115_v62, %v110_v1  ;;  %v266_v6 = vmul.u32.u64.high %v115_v62, %v110_v1, %v265_v5  ;;  %v122_v9 = vmul.u32 %v115_v62, %v106_v7 }
  0xa7   :  { %v262_v3 = vmul.u32.u64.low %v115_v62, %v114_v2  ;;  %v263_v4 = vmul.u32.u64.high %v115_v62, %v114_v2, %v262_v3 }
  0xa8   :  { %v125_v8 = vadd.s32 1, %v266_v6 }
  0xa9   :  { %vm124_vm5 = vc.u32 %v263_v4, %v265_v5  ;;  %v123_v22 = vadd.s32 %v265_v5, %v263_v4 }
  0xaa   :  { %v126_v10 = vsel %vm124_vm5, %v125_v8, %v266_v6 }
  0xab   :  { %v127_v11 = vadd.s32 %v126_v10, %v122_v9 }
  0xad   :  { %v128_v12 = vadd.s32 536870912, %v127_v11 }
  0xaf   :  { %v129_v13 = vshrl.u32 %v128_v12, 30 }
  0xb1   :  { %v130_v14 = vshll.u32 %v129_v13, 30  ;;  %v153_v35 = vsub.s32 4, %v129_v13 }
  0xb3   :  { %v131_v15 = vsub.s32 %v127_v11, %v130_v14  ;;  %v154_v38 = vsel %vm69_vm7, %v153_v35, %v129_v13 }
  0xb4   :  { %v156_v40 = vsel %vm68_vm8, 0, %v154_v38 }
  0xb5   :  { %v133_v16 = vsub.s32 0, %v131_v15  ;;  %v160_v41 = vadd.s32 3, %v156_v40 }
  0xb7   :  { %v182_v17 = vmin.u32 %v133_v16, %v131_v15  ;;  %v161_v42 = vand.u32 3, %v160_v41 }
  0xb9   :  { %v135_v18 = vclz %v182_v17  ;;  %vm166_vm9 = vcmp.eq.s32.totalorder %v161_v42, 2  ;;  %vm163_vm10 = vcmp.eq.s32.totalorder %v161_v42, 0  ;;  %vm162_vm11 = vcmp.lt.s32.totalorder %v161_v42, 2 }
  0xbb   :  { %v183_v19 = vadd.s32 4294967294, %v135_v18 }
  0xbd   :  { %vm184_vm6 = vcmp.lt.s32.totalorder %v183_v19, 0 }
  0xbe   :  { %v138_v20 = vsel %vm184_vm6, 0, %v183_v19 }
  0xbf   :  { %v139_v23 = vsub.s32 32, %v138_v20  ;;  %v143_v24 = vsub.s32 4294967266, %v138_v20  ;;  %v140_v25 = vshll.u32 %v131_v15, %v138_v20 }
  0xc1   :  { %v141_v27 = vshrl.u32 %v123_v22, %v139_v23  ;;  %v144_v28 = vadd.s32 127, %v143_v24 }
  0xc3   :  { %v142_v29 = vor.u32 %v141_v27, %v140_v25  ;;  %v145_v30 = vshll.u32 %v144_v28, 23 }
  0xc5   :  { %v146_v31 = vor.u32 4788187, %v145_v30  ;;  %v149_v33 = vcvt.s32.f32 %v142_v29 }
  0xc7   :  { %v147_v32 = vand.u32 2147483647, %v146_v31 }
  0xc9   :  { %v150_v34 = vmul.f32 %v149_v33, %v147_v32 }
  0xcb   :  { %v151_v36 = vxor.u32 2147483648, %v150_v34 }
  0xcd   :  { %v152_v37 = vsel %vm69_vm7, %v151_v36, %v150_v34 }
  0xce   :  { %v155_v39 = vsel %vm68_vm8, %v256_v21, %v152_v37 }
  0xcf   :  { %204 = vcosq.f32 %v155_v39 }
  0xd0   :  { %206 = vsinq.f32 %v155_v39 }
  0xd9   :  { %v205_v43 = vpop.eup %204 }
  0xda   :  { %v207_v44 = vpop.eup %206  ;;  %v167_v45 = vxor.u32 2147483648, %v205_v43 }
  0xdb   :  { %v164_v46 = vxor.u32 2147483648, %v207_v44 }
  0xdc   :  { %v168_v47 = vsel %vm166_vm9, %v167_v45, %v207_v44 }
  0xdd   :  { %v165_v48 = vsel %vm163_vm10, %v205_v43, %v164_v46 }
  0xde   :  { %v169_v26 = vsel %vm162_vm11, %v165_v48, %v168_v47 }
  0xdf   :  { %v170_v49 = vsel %vm159_vm12, nan, %v169_v26 }
  0xe0   :  { %171 = vst [vmem:[%s283_s3] sm:$0x3] %v170_v49 }

</bundles_post_ra>
